<compile_context>
chip_gen: v7x
topology: tpu7x:2x2x1
jax: 0.10.0
libtpu: 0.0.40
codegen_flags: <defaults>
</compile_context>

<pallas_src>
import functools
import math

import jax
import jax.numpy as jnp
import numpy as np
from jax import lax
from jax.experimental import pallas as pl
from jax.experimental.pallas import tpu as pltpu

_R_CHUNK = 128  # rounds streamed per grid step (lane width of the coefficient block)


def _round_up(x, m):
    return ((x + m - 1) // m) * m


def _num_thetas(N, M):
    K = N - M
    full = N * (N - 1) // 2
    return full if K <= 1 else full - K * (K - 1) // 2


@functools.lru_cache(maxsize=None)
def _build_schedule(N, M, n_pad):
    """Circle-method tournament over n_pad rows (host-side, static).

    Returns (pair_a, pair_b, theta_idx), each (n_rounds, half):
      round r pairs row pair_a[r,c] (top slot c) with pair_b[r,c] (bot slot c);
      theta_idx[r,c] is the flat theta index, or -1 for an identity rotation
      (padded row, or both indices >= M -- the frame-case parameter count).
    After n_rounds = n_pad - 1 slot advances the layout returns to natural order,
    which the kernel relies on.
    """
    half = n_pad // 2
    n_rounds = n_pad - 1
    layout = np.arange(n_pad, dtype=np.int64)
    pair_a = np.zeros((n_rounds, half), np.int32)
    pair_b = np.zeros((n_rounds, half), np.int32)
    theta_idx = np.full((n_rounds, half), -1, np.int64)
    k = 0
    for r in range(n_rounds):
        top, bot = layout[:half], layout[half:]
        pair_a[r], pair_b[r] = top, bot
        lo, hi = np.minimum(top, bot), np.maximum(top, bot)
        has = (hi < N) & (lo < M)
        idx = np.flatnonzero(has)
        theta_idx[r, idx] = k + np.arange(idx.size)
        k += idx.size
        # Circle-method slot advance (slot 0 fixed, the rest rotate by one).
        layout = np.concatenate(
            [layout[0:1], layout[2:half], layout[2 * half - 1:], layout[1:2],
             layout[half:2 * half - 1]])
    assert np.array_equal(layout, np.arange(n_pad)), "circle schedule did not close"
    assert k == _num_thetas(N, M), "theta count mismatch"
    return pair_a, pair_b, theta_idx


def _rotmat_kernel(cs_ref, out_ref, ntop_ref, nbot_ref, *, n_pad, half, n_rounds):
    """One (n_pad, tile_n) column slab; grid = (col_tile, round_chunk).

    cs_ref  : VMEM f32 (n_pad, 128)  rows 0..half-1 = cos per slot, half.. = sin,
                                     one lane per round of the current chunk.
    out_ref : VMEM f32 (n_pad, tile_n)  working state, resident across round chunks.
    ntop_ref, nbot_ref : VMEM f32 (half, tile_n) staging for the rotated halves.
    """
    tile_n = out_ref.shape[1]
    ch = pl.program_id(1)
    col0 = pl.program_id(0) * tile_n

    @pl.when(ch == 0)
    def _init():
        rows = lax.broadcasted_iota(jnp.int32, (n_pad, tile_n), 0)
        cols = lax.broadcasted_iota(jnp.int32, (n_pad, tile_n), 1) + col0
        out_ref[...] = jnp.where(rows == cols, 1.0, 0.0).astype(out_ref.dtype)

    lane = lax.broadcasted_iota(jnp.int32, (1, _R_CHUNK), 1)  # hoisted, loop-invariant

    def round_body(t, carry):
        g = ch * _R_CHUNK + t

        @pl.when(g < n_rounds)  # skip padded rounds entirely
        def _round():
            # Extract this round's (n_pad, 1) [cos; sin] column via a one-hot lane
            # reduction (robust on all generations; cost ~ n_pad*128 elems << slab work).
            onehot = (lane == t).astype(jnp.float32)
            cs = jnp.sum(cs_ref[...] * onehot, axis=1, keepdims=True)  # (n_pad, 1)
            cvec = cs[0:half, :]
            svec = cs[half:n_pad, :]

            top = out_ref[0:half, :]
            bot = out_ref[half:n_pad, :]
            ntop_ref[...] = cvec * top - svec * bot   # dense full-slab VPU updates
            nbot_ref[...] = svec * top + cvec * bot

            # Circle-method slot advance for the next round (static slab copies).
            out_ref[0:1, :] = ntop_ref[0:1, :]
            out_ref[1:half - 1, :] = ntop_ref[2:half, :]
            out_ref[half - 1:half, :] = nbot_ref[half - 1:half, :]
            out_ref[half:half + 1, :] = ntop_ref[1:2, :]
            out_ref[half + 1:n_pad, :] = nbot_ref[0:half - 1, :]

        return carry

    lax.fori_loop(0, _R_CHUNK, round_body, 0)  # static trip count


def _vmem_cap_bytes():
    try:
        return int(pltpu.get_tpu_info().vmem_capacity_bytes)
    except Exception:
        return 64 << 20  # conservative (v7x-sized) fallback


def _vmem_need(n_pad, tile_n):
    out_blk = n_pad * tile_n * 4          # double-buffered output block
    scratch = n_pad * tile_n * 4          # ntop + nbot staging
    cs_blk = n_pad * _R_CHUNK * 4         # double-buffered coefficient chunk
    return int((2 * out_blk + scratch + 2 * cs_blk) * 1.5) + (4 << 20)


def _choose_tile_n(ncols_pad, n_pad, vmem_budget):
    cands = [c for c in (2048, 1024, 512, 256, 128)
             if c <= ncols_pad and ncols_pad % c == 0]
    if not cands:
        return ncols_pad
    for c in cands:
        multi_tile_ok = (ncols_pad // c >= 2) or (ncols_pad == 128)  # 2-TC sharding
        if _vmem_need(n_pad, c) <= vmem_budget and multi_tile_ok:
            return c
    return cands[-1]


def rotmat_forward(thetas, N, M, nCols, tile_n=None):
    """JAX/Pallas equivalent of RotMatFunction.forward (glue + kernel call)."""
    n_thetas = _num_thetas(N, M)
    thetas = jnp.asarray(thetas, jnp.float32)
    assert thetas.shape == (n_thetas,)

    n_pad = _round_up(max(N, 16), 16)          # rows: halves stay 8-sublane aligned
    half = n_pad // 2
    n_rounds = n_pad - 1
    total_rounds = _round_up(n_rounds, _R_CHUNK)
    num_chunks = total_rounds // _R_CHUNK
    ncols_pad = _round_up(max(nCols, 1), 128)  # only needed columns, lane-dense

    # Host schedule; theta k -> flat (round, slot) position in row-major scan order.
    _, _, theta_idx = _build_schedule(N, M, n_pad)
    pos = np.flatnonzero(theta_idx.ravel() >= 0)

    flat = jnp.zeros((n_rounds * half,), jnp.float32).at[pos].set(thetas)
    tgrid = flat.reshape(n_rounds, half)       # theta=0 -> cos=1, sin=0 (identity)
    pad_r = total_rounds - n_rounds
    cos_g = jnp.pad(jnp.cos(tgrid), ((0, pad_r), (0, 0)))
    sin_g = jnp.pad(jnp.sin(tgrid), ((0, pad_r), (0, 0)))
    cs_sched = jnp.concatenate([cos_g.T, sin_g.T], axis=0)  # (n_pad, total_rounds)

    vmem_cap = _vmem_cap_bytes()
    vmem_budget = min(int(vmem_cap * 0.75), 100 << 20)
    if tile_n is None:
        tile_n = _choose_tile_n(ncols_pad, n_pad, vmem_budget)
    assert ncols_pad % tile_n == 0 and tile_n % 128 == 0
    num_tiles = ncols_pad // tile_n

    vmem_limit = int(min(max(_vmem_need(n_pad, tile_n), 32 << 20),
                         vmem_cap - (4 << 20)))

    kernel = functools.partial(_rotmat_kernel, n_pad=n_pad, half=half,
                               n_rounds=n_rounds)

    u = pl.pallas_call(
        kernel,
        out_shape=jax.ShapeDtypeStruct((n_pad, ncols_pad), jnp.float32),
        grid_spec=pltpu.PrefetchScalarGridSpec(
            num_scalar_prefetch=0,
            grid=(num_tiles, num_chunks),
            in_specs=[
                pl.BlockSpec((n_pad, _R_CHUNK), lambda c, ch: (0, ch)),  # cos/sin chunk
            ],
            out_specs=pl.BlockSpec((n_pad, tile_n), lambda c, ch: (0, c)),
            scratch_shapes=[
                pltpu.VMEM((half, tile_n), jnp.float32),
                pltpu.VMEM((half, tile_n), jnp.float32),
            ],
        ),
        compiler_params=pltpu.CompilerParams(
            dimension_semantics=("parallel", "arbitrary"),
            vmem_limit_bytes=vmem_limit,
        ),
    )(cs_sched)

    return u[:N, :nCols]


class RotMat:
    """Mirror of the torch RotMat module (parameters initialized in-script)."""

    def __init__(self, N, M=None, useFrame=False, key=None):
        M = N if M is None else M
        if M > N:
            raise Exception("M must be <= N")
        self.N, self.M = N, M
        nThetas = _num_thetas(N, M)
        key = jax.random.PRNGKey(0) if key is None else key
        # torch.nn.init.uniform_(thetas, 0, 4*pi), done deterministically here.
        self.thetas = jax.random.uniform(
            key, (nThetas,), dtype=jnp.float32, minval=0.0, maxval=4.0 * math.pi)
        self.nCols = M if useFrame else N

    def __call__(self):
        return rotmat_forward(self.thetas, self.N, self.M, self.nCols)


def _reference(thetas, N, M, nCols):
    """Pure numpy reference using the identical schedule / rotation convention."""
    n_pad = _round_up(max(N, 16), 16)
    pair_a, pair_b, theta_idx = _build_schedule(N, M, n_pad)
    t = np.asarray(thetas, np.float64)
    U = np.eye(N, dtype=np.float64)
    n_rounds, half = pair_a.shape
    for r in range(n_rounds):
        for c in range(half):
            k = theta_idx[r, c]
            if k < 0:
                continue
            a, b = int(pair_a[r, c]), int(pair_b[r, c])
            ca, sa = math.cos(t[k]), math.sin(t[k])
            ra, rb = U[a].copy(), U[b].copy()
            U[a] = ca * ra - sa * rb
            U[b] = sa * ra + ca * rb
    return U[:, :nCols]


if __name__ == "__main__":
    # Test 1: square orthogonal matrix (single column tile, single round chunk).
    N1, M1 = 16, 16
    mod1 = RotMat(N1, M1, useFrame=False, key=jax.random.PRNGKey(0))
    U1 = np.asarray(jax.block_until_ready(mod1()), np.float64)
    ref1 = _reference(np.asarray(mod1.thetas), N1, M1, mod1.nCols)
    assert U1.shape == (N1, N1)
    assert np.allclose(U1, ref1, atol=1e-4), "square kernel does not match reference"
    assert np.allclose(U1.T @ U1, np.eye(N1), atol=1e-4), "result not orthogonal"

    # Test 2: frame case (M < N, useFrame -> nCols = M); only needed columns computed.
    N2, M2 = 16, 8
    mod2 = RotMat(N2, M2, useFrame=True, key=jax.random.PRNGKey(1))
    U2 = np.asarray(jax.block_until_ready(mod2()), np.float64)
    ref2 = _reference(np.asarray(mod2.thetas), N2, M2, mod2.nCols)
    assert U2.shape == (N2, M2)
    assert np.allclose(U2, ref2, atol=1e-4), "frame-case mismatch"

    # Test 3: multi column-tile + multi round-chunk grid (2 tiles x 2 chunks at N=256).
    N3 = 256
    mod3 = RotMat(N3, N3, useFrame=False, key=jax.random.PRNGKey(2))
    U3 = np.asarray(jax.block_until_ready(
        rotmat_forward(mod3.thetas, N3, N3, N3, tile_n=128)), np.float64)
    ref3 = _reference(np.asarray(mod3.thetas), N3, N3, N3)
    assert U3.shape == (N3, N3)
    assert np.allclose(U3, ref3, atol=1e-3), "tiled kernel does not match reference"
    assert np.allclose(U3.T @ U3, np.eye(N3), atol=1e-3), "tiled result not orthogonal"

    print("KERNEL_OK")
</pallas_src>

<mosaic_0001>
module attributes {stable_mosaic.version = 11 : i64} {
  func.func @_rotmat_kernel(%arg0: i32, %arg1: i32, %arg2: memref<16x128xf32, #tpu.memory_space<vmem>>, %arg3: memref<16x128xf32, #tpu.memory_space<vmem>>, %arg4: memref<8x128xf32, #tpu.memory_space<vmem>>, %arg5: memref<8x128xf32, #tpu.memory_space<vmem>>) attributes {dimension_semantics = [#tpu.dimension_semantics<parallel>, #tpu.dimension_semantics<arbitrary>], iteration_bounds = array<i64: 1, 1>, scalar_prefetch = 0 : i64, scratch_operands = 2 : i64, tpu.core_type = #tpu.core_type<tc>, window_params = [{transform_indices = @transform_0, window_bounds = array<i64: 16, 128>}, {transform_indices = @transform_1, window_bounds = array<i64: 16, 128>}]} {
    %c128_i32 = arith.constant 128 : i32
    %0 = arith.muli %arg0, %c128_i32 : i32
    %c0_i32 = arith.constant 0 : i32
    %1 = arith.cmpi eq, %arg1, %c0_i32 : i32
    %2 = arith.extui %1 : i1 to i32
    %c0_i32_0 = arith.constant 0 : i32
    %3 = arith.cmpi ne, %2, %c0_i32_0 : i32
    scf.if %3 {
      %6 = tpu.iota {dimensions = array<i32: 0>} : vector<16x128xi32>
      %7 = tpu.iota {dimensions = array<i32: 1>} : vector<16x128xi32>
      %8 = vector.broadcast %0 : i32 to vector<16x128xi32>
      %9 = arith.addi %7, %8 : vector<16x128xi32>
      %10 = arith.cmpi eq, %6, %9 : vector<16x128xi32>
      %cst = arith.constant 1.000000e+00 : f32
      %cst_4 = arith.constant 0.000000e+00 : f32
      %11 = vector.broadcast %cst : f32 to vector<16x128xf32>
      %12 = vector.broadcast %cst_4 : f32 to vector<16x128xf32>
      %13 = arith.select %10, %11, %12 : vector<16x128xi1>, vector<16x128xf32>
      %c0 = arith.constant 0 : index
      %c0_5 = arith.constant 0 : index
      %14 = vector.load %arg3[%c0, %c0_5] : memref<16x128xf32, #tpu.memory_space<vmem>>, vector<16x128xf32>
      tpu.vector_store %arg3[%c0, %c0_5], %13 {strides = array<i32>} : memref<16x128xf32, #tpu.memory_space<vmem>>, vector<16x128xf32>,
    } else {
    }
    %4 = tpu.iota {dimensions = array<i32: 1>} : vector<1x128xi32>
    %c0_i32_1 = arith.constant 0 : i32
    %c128_i32_2 = arith.constant 128 : i32
    %5 = arith.addi %c0_i32_1, %c128_i32_2 : i32
    %c1_i32 = arith.constant 1 : i32
    scf.for %arg6 = %c0_i32_1 to %5 step %c1_i32  : i32 {
      %c128_i32_4 = arith.constant 128 : i32
      %6 = arith.muli %arg1, %c128_i32_4 : i32
      %7 = arith.addi %6, %arg6 : i32
      %c15_i32 = arith.constant 15 : i32
      %8 = arith.cmpi slt, %7, %c15_i32 : i32
      %9 = arith.extui %8 : i1 to i32
      %c0_i32_5 = arith.constant 0 : i32
      %10 = arith.cmpi ne, %9, %c0_i32_5 : i32
      scf.if %10 {
        %11 = vector.broadcast %arg6 : i32 to vector<1x128xi32>
        %12 = arith.cmpi eq, %4, %11 : vector<1x128xi32>
        %13 = arith.extui %12 : vector<1x128xi1> to vector<1x128xi32>
        %14 = arith.sitofp %13 : vector<1x128xi32> to vector<1x128xf32>
        %c0 = arith.constant 0 : index
        %c0_6 = arith.constant 0 : index
        %15 = vector.load %arg2[%c0, %c0_6] : memref<16x128xf32, #tpu.memory_space<vmem>>, vector<16x128xf32>
        %16 = vector.broadcast %14 : vector<1x128xf32> to vector<16x128xf32>
        %17 = arith.mulf %15, %16 : vector<16x128xf32>
        %cst = arith.constant dense<0.000000e+00> : vector<16xf32>
        %18 = vector.multi_reduction <add>, %17, %cst [1] : vector<16x128xf32> to vector<16xf32>
        %19 = vector.shape_cast %18 : vector<16xf32> to vector<16x1xf32>
        %20 = vector.extract_strided_slice %19 {offsets = [0, 0], sizes = [8, 1], strides = [1, 1]} : vector<16x1xf32> to vector<8x1xf32>
        %21 = vector.extract_strided_slice %19 {offsets = [8, 0], sizes = [8, 1], strides = [1, 1]} : vector<16x1xf32> to vector<8x1xf32>
        %c0_7 = arith.constant 0 : index
        %c0_8 = arith.constant 0 : index
        %22 = vector.load %arg3[%c0_7, %c0_8] : memref<16x128xf32, #tpu.memory_space<vmem>>, vector<8x128xf32>
        %c8 = arith.constant 8 : index
        %c0_9 = arith.constant 0 : index
        %23 = vector.load %arg3[%c8, %c0_9] : memref<16x128xf32, #tpu.memory_space<vmem>>, vector<8x128xf32>
        %24 = vector.broadcast %20 : vector<8x1xf32> to vector<8x128xf32>
        %25 = arith.mulf %24, %22 : vector<8x128xf32>
        %26 = vector.broadcast %21 : vector<8x1xf32> to vector<8x128xf32>
        %27 = arith.mulf %26, %23 : vector<8x128xf32>
        %28 = arith.subf %25, %27 : vector<8x128xf32>
        %c0_10 = arith.constant 0 : index
        %c0_11 = arith.constant 0 : index
        %29 = vector.load %arg4[%c0_10, %c0_11] : memref<8x128xf32, #tpu.memory_space<vmem>>, vector<8x128xf32>
        tpu.vector_store %arg4[%c0_10, %c0_11], %28 {strides = array<i32>} : memref<8x128xf32, #tpu.memory_space<vmem>>, vector<8x128xf32>,
        %30 = vector.broadcast %21 : vector<8x1xf32> to vector<8x128xf32>
        %31 = arith.mulf %30, %22 : vector<8x128xf32>
        %32 = vector.broadcast %20 : vector<8x1xf32> to vector<8x128xf32>
        %33 = arith.mulf %32, %23 : vector<8x128xf32>
        %34 = arith.addf %31, %33 : vector<8x128xf32>
        %c0_12 = arith.constant 0 : index
        %c0_13 = arith.constant 0 : index
        %35 = vector.load %arg5[%c0_12, %c0_13] : memref<8x128xf32, #tpu.memory_space<vmem>>, vector<8x128xf32>
        tpu.vector_store %arg5[%c0_12, %c0_13], %34 {strides = array<i32>} : memref<8x128xf32, #tpu.memory_space<vmem>>, vector<8x128xf32>,
        %c0_14 = arith.constant 0 : index
        %c0_15 = arith.constant 0 : index
        %36 = vector.load %arg4[%c0_14, %c0_15] : memref<8x128xf32, #tpu.memory_space<vmem>>, vector<1x128xf32>
        %c0_16 = arith.constant 0 : index
        %c0_17 = arith.constant 0 : index
        %37 = vector.load %arg3[%c0_16, %c0_17] : memref<16x128xf32, #tpu.memory_space<vmem>>, vector<1x128xf32>
        tpu.vector_store %arg3[%c0_16, %c0_17], %36 {strides = array<i32>} : memref<16x128xf32, #tpu.memory_space<vmem>>, vector<1x128xf32>,
        %c2 = arith.constant 2 : index
        %c0_18 = arith.constant 0 : index
        %38 = vector.load %arg4[%c2, %c0_18] : memref<8x128xf32, #tpu.memory_space<vmem>>, vector<6x128xf32>
        %c1 = arith.constant 1 : index
        %c0_19 = arith.constant 0 : index
        %39 = vector.load %arg3[%c1, %c0_19] : memref<16x128xf32, #tpu.memory_space<vmem>>, vector<6x128xf32>
        tpu.vector_store %arg3[%c1, %c0_19], %38 {strides = array<i32>} : memref<16x128xf32, #tpu.memory_space<vmem>>, vector<6x128xf32>,
        %c7 = arith.constant 7 : index
        %c0_20 = arith.constant 0 : index
        %40 = vector.load %arg5[%c7, %c0_20] : memref<8x128xf32, #tpu.memory_space<vmem>>, vector<1x128xf32>
        %c7_21 = arith.constant 7 : index
        %c0_22 = arith.constant 0 : index
        %41 = vector.load %arg3[%c7_21, %c0_22] : memref<16x128xf32, #tpu.memory_space<vmem>>, vector<1x128xf32>
        tpu.vector_store %arg3[%c7_21, %c0_22], %40 {strides = array<i32>} : memref<16x128xf32, #tpu.memory_space<vmem>>, vector<1x128xf32>,
        %c1_23 = arith.constant 1 : index
        %c0_24 = arith.constant 0 : index
        %42 = vector.load %arg4[%c1_23, %c0_24] : memref<8x128xf32, #tpu.memory_space<vmem>>, vector<1x128xf32>
        %c8_25 = arith.constant 8 : index
        %c0_26 = arith.constant 0 : index
        %43 = vector.load %arg3[%c8_25, %c0_26] : memref<16x128xf32, #tpu.memory_space<vmem>>, vector<1x128xf32>
        tpu.vector_store %arg3[%c8_25, %c0_26], %42 {strides = array<i32>} : memref<16x128xf32, #tpu.memory_space<vmem>>, vector<1x128xf32>,
        %c0_27 = arith.constant 0 : index
        %c0_28 = arith.constant 0 : index
        %44 = vector.load %arg5[%c0_27, %c0_28] : memref<8x128xf32, #tpu.memory_space<vmem>>, vector<7x128xf32>
        %c9 = arith.constant 9 : index
        %c0_29 = arith.constant 0 : index
        %45 = vector.load %arg3[%c9, %c0_29] : memref<16x128xf32, #tpu.memory_space<vmem>>, vector<7x128xf32>
        tpu.vector_store %arg3[%c9, %c0_29], %44 {strides = array<i32>} : memref<16x128xf32, #tpu.memory_space<vmem>>, vector<7x128xf32>,
      } else {
      }
    }
    %c128_i32_3 = arith.constant 128 : i32
    return
  }
  func.func @transform_0(%arg0: i32, %arg1: i32) -> (i32, i32) {
    %c0_i32 = arith.constant 0 : i32
    %c0_i32_0 = arith.constant 0 : i32
    return %c0_i32, %arg1 : i32, i32
  }
  func.func @transform_1(%arg0: i32, %arg1: i32) -> (i32, i32) {
    %c0_i32 = arith.constant 0 : i32
    %c0_i32_0 = arith.constant 0 : i32
    return %c0_i32, %arg0 : i32, i32
  }
}

</mosaic_0001>

<bundles_post_ra>
// kernel: tpu_custom_call.1
= control target key start
LH: loop header
LB: loop body
LE: loop exit
PB: predicated region body
PF: predicated region fallthrough
CT: control target
= control target key end

     0   :  { %6 = vsyncpa [#allocation5], 0  ;;  %s237_s0 = inlined_call_operand.hbm [shape: f32[16,128], index: 0, kind: input, shape index: {}]   ;;  %s238_s1 = inlined_call_operand.hbm [shape: f32[16,128], index: 1, kind: output, shape index: {}]  }
   0x1   :  { %7 = vsyncpa [#allocation6], 0  ;;  %s181_s6 = smov [#allocation4]   ;;  %s125_s10 = scalar_lea.hbm %s237_s0, 256 }
   0x2   :  { %s13_s7 = sshll.u32 %s181_s6, 4  ;;  %p126_p0 = scmp.ne.s32.totalorder %s237_s0, %s125_s10  ;;  %s14_s7 = int_to_ptr.vmem [resolvable:$true] %s13_s7 }
   0x3   :  { %p129_p1 = scmp.lt.u32.totalorder %s125_s10, %s237_s0 }
   0x5   :  { %p131_p2 = pnand %p129_p1, %p126_p0 }
   0x7   :  { %134 = shalt.err (!%p131_p2)
}
   0x8   :  { %s135_s15 = scalar_lea.vmem %s14_s7, 256  ;;  %p140_p4 = scmp.lt.s32.totalorder %s14_s7, %s14_s7 }
   0x9   :  { %p136_p3 = scmp.ne.s32.totalorder %s14_s7, %s135_s15  ;;  %p141_p5 = scmp.lt.s32.totalorder %s135_s15, %s135_s15 }
   0xb   :  { %p142_p6 = por %p141_p5, %p140_p4 }
   0xd   :  { %p143_p7 = pnand %p142_p6, %p136_p3 }
   0xf   :  { %146 = shalt.err (!%p143_p7)
}
  0x10   :  { %s182_s16 = smov 128   ;;  %s183_s17 = smov 8  }
  0x11   :  { %19 = dma.hbm_to_vmem [thread:$0]  %s237_s0, 256, %s14_s7, [#allocation5], %s182_s16, %s182_s16, %s183_s17  }
  0x12   :  { %173 = dma.done.wait [#allocation5], 256  }
  0x13   :  { %174 = vsyncadd [#allocation5], 4294967040  ;;  %v28_v0 = vlaneseq  ;;  %v184_v4 = vmov 0.0   ;;  %s212_s20 = smov 0  }
  0x15   :  { %v29_v1 = vshrl.u32 %v28_v0, 7  ;;  %v32_v2 = vand.u32 127, %v28_v0 }
  0x17   :  { %vm35_vm0 = vcmp.eq.s32.totalorder %v29_v1, %v32_v2  ;;  %v30_v3 = vadd.s32 8, %v29_v1 }
  0x18   :  { %v37_v5 = vsel %vm35_vm0, 1.0, %v184_v4 }
  0x19   :  { %39 = vst [vmem:[#allocation7] sm:$0xff] %v37_v5  ;;  %vm36_vm1 = vcmp.eq.s32.totalorder %v30_v3, %v32_v2 }
  0x1a   :  { %v38_v6 = vsel %vm36_vm1, 1.0, %v184_v4 }
  0x1b   :  { %40 = vst [vmem:[#allocation7 + $0x8] sm:$0xff] %v38_v6 }
  0x1c LB: > { %p109_p8 = scmp.ge.s32.totalorder %s179_s20, 15  ;;  %s179_s20 = sphi %s212_s20, %s48_s20  }
  0x1d   : > { %v55_v7 = vstv (!%p109_p8), %s179_s20  ;;  %v59_v8 = vld [vmem:[#allocation4] sm:$0xff] (!%p109_p8)  ;;  %v185_v9 = vmov (!%p109_p8), 0.0   ;;  %v60_v11 = vld [vmem:[#allocation4 + $0x8] sm:$0xff] (!%p109_p8) }
  0x1e   : > { %54 = sbr.rel (%p109_p8) target bundleno = 195 (0xc3), region = 24  ;;  %vm56_vm2 = vcmp.eq.s32.totalorder (!%p109_p8), %v32_v2, %v55_v7 }
  0x1f   : > { %v110_v10 = vsel (!%p109_p8), %vm56_vm2, 1.0, %v185_v9 }
  0x20   : > { %v61_v12 = vmul.f32 (!%p109_p8), %v110_v10, %v59_v8  ;;  %v62_v13 = vmul.f32 (!%p109_p8), %v110_v10, %v60_v11  ;;  %v67_v15 = vld [vmem:[#allocation7] sm:$0xff] (!%p109_p8) }
  0x22   : > { %63 = vadd.xlane.f32.xlu0 (!%p109_p8), %v61_v12  ;;  %v68_v16 = vld [vmem:[#allocation7 + $0x8] sm:$0xff] (!%p109_p8) }
  0x26   : > { %65 = vadd.xlane.f32.xlu0 %v62_v13 }
  0xaf   : > { %v64_v14 = vpop.xlane.xlu0 %63 }
  0xb0   : > { %v69_v18 = vmul.f32 %v67_v15, %v64_v14  ;;  %v74_v19 = vmul.f32 %v68_v16, %v64_v14 }
  0xb3   : > { %v66_v17 = vpop.xlane.xlu0 %65 }
  0xb4   : > { %v70_v20 = vmul.f32 %v68_v16, %v66_v17  ;;  %v73_v21 = vmul.f32 %v67_v15, %v66_v17 }
  0xb6   : > { %v71_v22 = vsub.f32 %v69_v18, %v70_v20  ;;  %v75_v23 = vadd.f32 %v74_v19, %v73_v21 }
  0xb8   : > { %72 = vst [vmem:[#allocation2] sm:$0xff] %v71_v22  ;;  %76 = vst [vmem:[#allocation3] sm:$0xff] %v75_v23 }
  0xbf   : > { %v77_v24 = vld [vmem:[#allocation2] sm:$0x1]  ;;  %v79_v25 = vld [vmem:[#allocation2 + $0x2] sm:$0x3f]  ;;  %v81_v26 = vld [vmem:[#allocation3 + $0x7] sm:$0x1] }
  0xc0   : > { %78 = vst [vmem:[#allocation7] sm:$0x1] %v77_v24  ;;  %80 = vst [vmem:[#allocation7 + $0x1] sm:$0x3f] %v79_v25  ;;  %v83_v27 = vld [vmem:[#allocation2 + $0x1] sm:$0x1] }
  0xc1   : > { %82 = vst [vmem:[#allocation7 + $0x7] sm:$0x1] %v81_v26  ;;  %v85_v28 = vld [vmem:[#allocation3] sm:$0x7f]  ;;  %84 = vst [vmem:[#allocation7 + $0x8] sm:$0x1] %v83_v27 }
  0xc2   : > { %86 = vst [vmem:[#allocation7 + $0x9] sm:$0x7f] %v85_v28 }
  0xc3 PF: > { %s48_s20 = sadd.s32 1, %s179_s20  }
  0xc4   : > { %p45_p9 = scmp.ge.s32.totalorder %s48_s20, 128  }
  0xc5   :  { %s186_s0 = smov (%p45_p9), [#allocation7]  }
  0xc6   :  { %47 = sbr.rel (!%p45_p9) target bundleno = 28 (0x1c), region = 43  ;;  %s92_s21 = sshll.u32 (%p45_p9), %s186_s0, 4  ;;  %s93_s21 = int_to_ptr.vmem [resolvable:$true] %s92_s21 }
  0xc7   :  { %s147_s22 = scalar_lea.vmem (%p45_p9), %s93_s21, 256  ;;  %p152_p11 = scmp.lt.s32.totalorder (%p45_p9), %s93_s21, %s93_s21 }
  0xc8   :  { %p148_p10 = scmp.ne.s32.totalorder (%p45_p9), %s93_s21, %s147_s22  ;;  %p153_p12 = scmp.lt.s32.totalorder (%p45_p9), %s147_s22, %s147_s22 }
  0xca   :  { %p154_p13 = por (%p45_p9), %p153_p12, %p152_p11 }
  0xcc   :  { %p155_p0 = pnand (%p45_p9), %p154_p13, %p148_p10 }
  0xce   :  { %158 = shalt.err (!%p155_p0)
}
  0xcf   :  { %s159_s25 = scalar_lea.hbm %s238_s1, 256 }
  0xd0   :  { %p160_p1 = scmp.ne.s32.totalorder %s238_s1, %s159_s25  ;;  %p163_p2 = scmp.lt.u32.totalorder %s159_s25, %s238_s1 }
  0xd2   :  { %p165_p3 = pnand %p163_p2, %p160_p1 }
  0xd4   :  { %168 = shalt.err (!%p165_p3)
}
  0xd5   :  { %98 = dma.vmem_to_hbm [thread:$0]  %s93_s21, 256, %s238_s1, [#allocation6], %s182_s16, %s182_s16, %s183_s17  }
  0xd6   :  { %175 = dma.done.wait [#allocation6], 256  }
  0xd7   :  { %176 = vsyncadd [#allocation6], 4294967040 }
  0xd8   :  { %102 = vsyncpa [#allocation5], 1 }
  0xd9   :  { %103 = vsyncpa [#allocation6], 1 }

</bundles_post_ra>
